<compile_context>
chip_gen: v6e
topology: v6e:2x2x1
jax: 0.10.0
libtpu: 0.0.40
codegen_flags: <defaults>
</compile_context>

<pallas_src>
import functools

import jax
import jax.numpy as jnp
import numpy as np
from jax.experimental import pallas as pl
from jax.experimental.pallas import tpu as pltpu


# ----------------------------------------------------------------------------
# Kernel
# ----------------------------------------------------------------------------
def _qwen_post_attn_kernel(attn_ref, res_ref, wc_ref, g_ref, w12_ref, wo_ref,
                           out_ref, ln_in_sc, ln_out_sc, acc_sc, *, eps, tf):
    kf = pl.program_id(1)

    @pl.when(kf == 0)
    def _prologue():
        # attn.c_proj : bf16 operands, f32 MXU accumulation
        attn_proj = jnp.dot(attn_ref[...].astype(wc_ref.dtype), wc_ref[...],
                            preferred_element_type=jnp.float32)
        # residual add (this sum is also the residual of the final add) -- f32
        ln_in = attn_proj + res_ref[...]
        ln_in_sc[...] = ln_in
        # ln_2 : RMSNorm over the full hidden dim, f32 math
        var = jnp.mean(ln_in * ln_in, axis=-1, keepdims=True)
        ln_out = ln_in * jax.lax.rsqrt(var + eps) * g_ref[...]
        # MLP LHS is reused for every F-chunk; store once in matmul dtype
        ln_out_sc[...] = ln_out.astype(ln_out_sc.dtype)
        acc_sc[...] = jnp.zeros_like(acc_sc)

    # ---- Qwen MLP, F-chunk kf: fused [w1 | w2] up-projection ----------------
    ln_out = ln_out_sc[...]
    a12 = jnp.dot(ln_out, w12_ref[...], preferred_element_type=jnp.float32)
    a1 = a12[:, :tf]
    a2 = a12[:, tf:]
    inter = a1 * (a2 * jax.nn.sigmoid(a2))          # a1 * silu(a2)
    acc_sc[...] += jnp.dot(inter.astype(wo_ref.dtype), wo_ref[...],
                           preferred_element_type=jnp.float32)

    @pl.when(kf == pl.num_programs(1) - 1)
    def _epilogue():
        out_ref[...] = ln_in_sc[...] + acc_sc[...]


# ----------------------------------------------------------------------------
# One-time weight preparation (hoisted out of the per-call path)
# ----------------------------------------------------------------------------
def prepare_weights(params, *, tf, matmul_dtype=jnp.bfloat16):
    """Transpose weights to [in, out], fuse w1/w2 per F-chunk into one
    [H, 2F] matrix (chunk kf = [w1_chunk_kf | w2_chunk_kf]) and cast matmul
    weights to bf16.  Done once per model, not per forward call."""
    wc = jnp.asarray(params["c_proj_w"]).T.astype(matmul_dtype)      # [H, H]
    w1 = jnp.asarray(params["mlp_w1"]).T.astype(jnp.float32)         # [H, F]
    w2 = jnp.asarray(params["mlp_w2"]).T.astype(jnp.float32)         # [H, F]
    wo = jnp.asarray(params["mlp_c_proj_w"]).T.astype(matmul_dtype)  # [F, H]
    H, F = w1.shape
    assert F % tf == 0, "F_half must be divisible by the F tile"
    nf = F // tf
    w12 = jnp.concatenate(
        [w1.reshape(H, nf, 1, tf), w2.reshape(H, nf, 1, tf)], axis=2
    ).reshape(H, 2 * F).astype(matmul_dtype)                         # [H, 2F]
    g = jnp.asarray(params["ln_2_w"]).reshape(1, H).astype(jnp.float32)
    return {"wc": wc, "g": g, "w12": w12, "wo": wo, "tf": tf}


def _pick_tm(M, cap=256):
    """Token tile: large multiple of 8 (MXU-friendly), but keep >=2 grid steps
    on the parallel axis when M is big enough (v7x has 2 TensorCores)."""
    if M >= 2 * cap:
        target = cap
    elif M >= 256:
        target = M // 2
    else:
        target = M
    t = max(8, min(target - target % 8, M))
    while t >= 8:
        if M % t == 0:
            return t
        t -= 8
    return M


def _pick_tf(F_half, cap=512):
    """F-chunk tile: prefer multiples of 128 (lane-aligned split of [w1|w2])."""
    if F_half <= cap:
        return F_half
    for step in (128, 8):
        t = min(cap, F_half)
        t -= t % step
        while t >= step:
            if F_half % t == 0:
                return t
            t -= step
    return F_half


# ----------------------------------------------------------------------------
# Wrapper
# ----------------------------------------------------------------------------
def qwen_post_attn_block(attn_out, residual, prepped, *, eps=1e-6, tm=None):
    """attn_out, residual: [B, S, H] float32.  `prepped` from prepare_weights."""
    B, S, H = attn_out.shape
    M = B * S
    wc, g, w12, wo = prepped["wc"], prepped["g"], prepped["w12"], prepped["wo"]
    tf = prepped["tf"]
    F = wo.shape[0]
    nf = F // tf
    if tm is None:
        tm = _pick_tm(M)
    assert M % tm == 0

    x2 = attn_out.reshape(M, H)
    r2 = residual.reshape(M, H)

    # --- VMEM budget (explicit scoped limit, sized from the real footprint) --
    wbytes = wc.dtype.itemsize
    act = tm * H * 4
    vmem_est = (
        2 * 2 * act                              # attn/res input tiles (x2 buf)
        + 2 * act                                # output tile (x2 buf)
        + H * H * wbytes + H * 4                 # wc (single-buffered) + gain
        + 2 * 3 * H * tf * wbytes                # w12 + wo chunks (x2 buf)
        + 2 * act + tm * H * wbytes              # scratch: ln_in, acc, ln_out
    )
    vmem_limit = int(min(max(int(vmem_est * 1.5), 32 * 1024 * 1024),
                         64 * 1024 * 1024))      # stay within v7x physical VMEM

    # --- advisory cost estimate for the XLA scheduler ------------------------
    cost = pl.CostEstimate(
        flops=2 * M * H * (H + 3 * F),
        transcendentals=M * F,                   # sigmoid
        bytes_accessed=int(3 * M * H * 4 + (H * H + 3 * H * F) * wbytes),
    )

    kernel = functools.partial(_qwen_post_attn_kernel, eps=eps, tf=tf)

    out = pl.pallas_call(
        kernel,
        out_shape=jax.ShapeDtypeStruct((M, H), jnp.float32),
        grid_spec=pltpu.PrefetchScalarGridSpec(
            num_scalar_prefetch=0,
            grid=(M // tm, nf),                  # tokens (parallel), F chunks (reduction)
            in_specs=[
                pl.BlockSpec((tm, H), lambda i, kf: (i, 0)),   # attn_out tile
                pl.BlockSpec((tm, H), lambda i, kf: (i, 0)),   # residual tile
                pl.BlockSpec((H, H), lambda i, kf: (0, 0),     # attn.c_proj (const)
                             pipeline_mode=pl.Buffered(1)),
                pl.BlockSpec((1, H), lambda i, kf: (0, 0),     # ln_2 gain (const)
                             pipeline_mode=pl.Buffered(1)),
                pl.BlockSpec((H, 2 * tf), lambda i, kf: (0, kf)),  # fused [w1|w2] chunk
                pl.BlockSpec((tf, H), lambda i, kf: (kf, 0)),      # mlp.c_proj chunk
            ],
            out_specs=pl.BlockSpec((tm, H), lambda i, kf: (i, 0)),
            scratch_shapes=[
                pltpu.VMEM((tm, H), jnp.float32),   # ln_in (residual), f32
                pltpu.VMEM((tm, H), wc.dtype),      # ln_out in matmul dtype
                pltpu.VMEM((tm, H), jnp.float32),   # MLP output accumulator, f32
            ],
        ),
        compiler_params=pltpu.CompilerParams(
            dimension_semantics=("parallel", "arbitrary"),
            vmem_limit_bytes=vmem_limit),
        cost_estimate=cost,
    )(x2, r2, wc, g, w12, wo)

    return out.reshape(B, S, H)


# ----------------------------------------------------------------------------
# Pure-JAX reference (fp32, mirrors the PyTorch forward)
# ----------------------------------------------------------------------------
def reference(attn_out, residual, params, eps=1e-6):
    x = attn_out @ params["c_proj_w"].T
    ln_in = x + residual
    var = jnp.mean(ln_in * ln_in, axis=-1, keepdims=True)
    ln_out = ln_in * jax.lax.rsqrt(var + eps) * params["ln_2_w"]
    a1 = ln_out @ params["mlp_w1"].T
    a2 = ln_out @ params["mlp_w2"].T
    mlp = (a1 * (a2 * jax.nn.sigmoid(a2))) @ params["mlp_c_proj_w"].T
    return ln_in + mlp


def make_params(key, hidden, ff_half):
    """Deterministic synthetic weights, stored PyTorch-style [out, in]."""
    ks = jax.random.split(key, 5)
    scale = 0.05
    return {
        "c_proj_w": scale * jax.random.normal(ks[0], (hidden, hidden), jnp.float32),
        "ln_2_w": 1.0 + 0.01 * jax.random.normal(ks[1], (hidden,), jnp.float32),
        "mlp_w1": scale * jax.random.normal(ks[2], (ff_half, hidden), jnp.float32),
        "mlp_w2": scale * jax.random.normal(ks[3], (ff_half, hidden), jnp.float32),
        "mlp_c_proj_w": scale * jax.random.normal(ks[4], (hidden, ff_half), jnp.float32),
    }


if __name__ == "__main__":
    base_key = jax.random.PRNGKey(0)

    # Small test shapes: case 1 matches the original toy (single F chunk),
    # case 2 uses lane-dense H=128 and exercises F tiling/accumulation (nf=2).
    test_cases = [
        # (B, S, H, FF_HALF, tf)
        (2, 8, 32, 64, None),
        (2, 64, 128, 256, 128),
    ]

    for idx, (B, S, H, FF_HALF, tf) in enumerate(test_cases):
        k_attn, k_res, k_params = jax.random.split(
            jax.random.fold_in(base_key, idx), 3)
        attn_out = jax.random.normal(k_attn, (B, S, H), jnp.float32)
        residual = jax.random.normal(k_res, (B, S, H), jnp.float32)
        params = make_params(k_params, H, FF_HALF)

        if tf is None:
            tf = _pick_tf(FF_HALF)
        prepped = prepare_weights(params, tf=tf)   # one-time weight prep

        out = qwen_post_attn_block(attn_out, residual, prepped)
        out = jax.block_until_ready(out)

        ref = reference(attn_out, residual, params)
        # bf16 matmul operands with f32 accumulation -> bf16-level tolerance.
        np.testing.assert_allclose(np.asarray(out), np.asarray(ref),
                                   rtol=2e-2, atol=2e-2)

    print("KERNEL_OK")
</pallas_src>

<mosaic_0001>
module attributes {stable_mosaic.version = 11 : i64} {
  func.func @_qwen_post_attn_kernel(%arg0: i32, %arg1: i32, %arg2: memref<16x32xf32, #tpu.memory_space<vmem>>, %arg3: memref<16x32xf32, #tpu.memory_space<vmem>>, %arg4: memref<32x32xbf16, #tpu.memory_space<vmem>>, %arg5: memref<1x32xf32, #tpu.memory_space<vmem>>, %arg6: memref<32x128xbf16, #tpu.memory_space<vmem>>, %arg7: memref<64x32xbf16, #tpu.memory_space<vmem>>, %arg8: memref<16x32xf32, #tpu.memory_space<vmem>>, %arg9: memref<16x32xf32, #tpu.memory_space<vmem>>, %arg10: memref<16x32xbf16, #tpu.memory_space<vmem>>, %arg11: memref<16x32xf32, #tpu.memory_space<vmem>>) attributes {dimension_semantics = [#tpu.dimension_semantics<parallel>, #tpu.dimension_semantics<arbitrary>], iteration_bounds = array<i64: 1, 1>, scalar_prefetch = 0 : i64, scratch_operands = 3 : i64, tpu.core_type = #tpu.core_type<tc>, window_params = [{transform_indices = @transform_0, window_bounds = array<i64: 16, 32>}, {transform_indices = @transform_1, window_bounds = array<i64: 16, 32>}, {pipeline_mode = #tpu.pipeline_mode<synchronous>, transform_indices = @transform_2, window_bounds = array<i64: 32, 32>}, {pipeline_mode = #tpu.pipeline_mode<synchronous>, transform_indices = @transform_3, window_bounds = array<i64: 1, 32>}, {transform_indices = @transform_4, window_bounds = array<i64: 32, 128>}, {transform_indices = @transform_5, window_bounds = array<i64: 64, 32>}, {transform_indices = @transform_6, window_bounds = array<i64: 16, 32>}]} {
    %c0_i32 = arith.constant 0 : i32
    %0 = arith.cmpi eq, %arg1, %c0_i32 : i32
    %1 = arith.extui %0 : i1 to i32
    %c0_i32_0 = arith.constant 0 : i32
    %2 = arith.cmpi ne, %1, %c0_i32_0 : i32
    scf.if %2 {
      %c0_14 = arith.constant 0 : index
      %c0_15 = arith.constant 0 : index
      %24 = vector.load %arg2[%c0_14, %c0_15] : memref<16x32xf32, #tpu.memory_space<vmem>>, vector<16x32xf32>
      %25 = arith.truncf %24 : vector<16x32xf32> to vector<16x32xbf16>
      %c0_16 = arith.constant 0 : index
      %c0_17 = arith.constant 0 : index
      %26 = vector.load %arg4[%c0_16, %c0_17] : memref<32x32xbf16, #tpu.memory_space<vmem>>, vector<32x32xbf16>
      %cst_18 = arith.constant dense<0.000000e+00> : vector<16x32xf32>
      %27 = tpu.matmul %25, %26, %cst_18 {dimension_numbers = #tpu.dot_dimension_numbers<[1], [0], [0], [1], [0, 0, 1, 1], [], []>} : vector<16x32xbf16>, vector<32x32xbf16>, vector<16x32xf32> -> vector<16x32xf32>
      %c0_19 = arith.constant 0 : index
      %c0_20 = arith.constant 0 : index
      %28 = vector.load %arg3[%c0_19, %c0_20] : memref<16x32xf32, #tpu.memory_space<vmem>>, vector<16x32xf32>
      %29 = arith.addf %27, %28 : vector<16x32xf32>
      %c0_21 = arith.constant 0 : index
      %c0_22 = arith.constant 0 : index
      %30 = vector.load %arg9[%c0_21, %c0_22] : memref<16x32xf32, #tpu.memory_space<vmem>>, vector<16x32xf32>
      tpu.vector_store %arg9[%c0_21, %c0_22], %29 {strides = array<i32>} : memref<16x32xf32, #tpu.memory_space<vmem>>, vector<16x32xf32>,
      %31 = arith.mulf %29, %29 : vector<16x32xf32>
      %cst_23 = arith.constant dense<0.000000e+00> : vector<16xf32>
      %32 = vector.multi_reduction <add>, %31, %cst_23 [1] : vector<16x32xf32> to vector<16xf32>
      %33 = vector.shape_cast %32 : vector<16xf32> to vector<16x1xf32>
      %cst_24 = arith.constant 3.200000e+01 : f32
      %34 = vector.broadcast %cst_24 : f32 to vector<16x1xf32>
      %35 = arith.divf %33, %34 : vector<16x1xf32>
      %cst_25 = arith.constant 9.99999997E-7 : f32
      %36 = vector.broadcast %cst_25 : f32 to vector<16x1xf32>
      %37 = arith.addf %35, %36 : vector<16x1xf32>
      %38 = math.rsqrt %37 : vector<16x1xf32>
      %39 = vector.broadcast %38 : vector<16x1xf32> to vector<16x32xf32>
      %40 = arith.mulf %29, %39 : vector<16x32xf32>
      %c0_26 = arith.constant 0 : index
      %c0_27 = arith.constant 0 : index
      %41 = vector.load %arg5[%c0_26, %c0_27] : memref<1x32xf32, #tpu.memory_space<vmem>>, vector<1x32xf32>
      %42 = vector.broadcast %41 : vector<1x32xf32> to vector<16x32xf32>
      %43 = arith.mulf %40, %42 : vector<16x32xf32>
      %44 = arith.truncf %43 : vector<16x32xf32> to vector<16x32xbf16>
      %c0_28 = arith.constant 0 : index
      %c0_29 = arith.constant 0 : index
      %45 = vector.load %arg10[%c0_28, %c0_29] : memref<16x32xbf16, #tpu.memory_space<vmem>>, vector<16x32xbf16>
      tpu.vector_store %arg10[%c0_28, %c0_29], %44 {strides = array<i32>} : memref<16x32xbf16, #tpu.memory_space<vmem>>, vector<16x32xbf16>,
      %cst_30 = arith.constant 0.000000e+00 : f32
      %46 = vector.broadcast %cst_30 : f32 to vector<16x32xf32>
      %c0_31 = arith.constant 0 : index
      %c0_32 = arith.constant 0 : index
      %47 = vector.load %arg11[%c0_31, %c0_32] : memref<16x32xf32, #tpu.memory_space<vmem>>, vector<16x32xf32>
      tpu.vector_store %arg11[%c0_31, %c0_32], %46 {strides = array<i32>} : memref<16x32xf32, #tpu.memory_space<vmem>>, vector<16x32xf32>,
    } else {
    }
    %c0 = arith.constant 0 : index
    %c0_1 = arith.constant 0 : index
    %3 = vector.load %arg10[%c0, %c0_1] : memref<16x32xbf16, #tpu.memory_space<vmem>>, vector<16x32xbf16>
    %c0_2 = arith.constant 0 : index
    %c0_3 = arith.constant 0 : index
    %4 = vector.load %arg6[%c0_2, %c0_3] : memref<32x128xbf16, #tpu.memory_space<vmem>>, vector<32x128xbf16>
    %cst = arith.constant dense<0.000000e+00> : vector<16x128xf32>
    %5 = tpu.matmul %3, %4, %cst {dimension_numbers = #tpu.dot_dimension_numbers<[1], [0], [0], [1], [0, 0, 1, 1], [], []>} : vector<16x32xbf16>, vector<32x128xbf16>, vector<16x128xf32> -> vector<16x128xf32>
    %6 = vector.extract_strided_slice %5 {offsets = [0, 0], sizes = [16, 64], strides = [1, 1]} : vector<16x128xf32> to vector<16x64xf32>
    %7 = vector.extract_strided_slice %5 {offsets = [0, 64], sizes = [16, 64], strides = [1, 1]} : vector<16x128xf32> to vector<16x64xf32>
    %8 = arith.negf %7 : vector<16x64xf32>
    %9 = math.exp %8 : vector<16x64xf32>
    %cst_4 = arith.constant 1.000000e+00 : f32
    %10 = vector.broadcast %cst_4 : f32 to vector<16x64xf32>
    %11 = arith.addf %10, %9 : vector<16x64xf32>
    %12 = arith.divf %10, %11 : vector<16x64xf32>
    %13 = arith.mulf %7, %12 : vector<16x64xf32>
    %14 = arith.mulf %6, %13 : vector<16x64xf32>
    %c0_5 = arith.constant 0 : index
    %c0_6 = arith.constant 0 : index
    %15 = vector.load %arg11[%c0_5, %c0_6] : memref<16x32xf32, #tpu.memory_space<vmem>>, vector<16x32xf32>
    %16 = arith.truncf %14 : vector<16x64xf32> to vector<16x64xbf16>
    %c0_7 = arith.constant 0 : index
    %c0_8 = arith.constant 0 : index
    %17 = vector.load %arg7[%c0_7, %c0_8] : memref<64x32xbf16, #tpu.memory_space<vmem>>, vector<64x32xbf16>
    %cst_9 = arith.constant dense<0.000000e+00> : vector<16x32xf32>
    %18 = tpu.matmul %16, %17, %cst_9 {dimension_numbers = #tpu.dot_dimension_numbers<[1], [0], [0], [1], [0, 0, 1, 1], [], []>} : vector<16x64xbf16>, vector<64x32xbf16>, vector<16x32xf32> -> vector<16x32xf32>
    %19 = arith.addf %15, %18 : vector<16x32xf32>
    %c0_10 = arith.constant 0 : index
    %c0_11 = arith.constant 0 : index
    %20 = vector.load %arg11[%c0_10, %c0_11] : memref<16x32xf32, #tpu.memory_space<vmem>>, vector<16x32xf32>
    tpu.vector_store %arg11[%c0_10, %c0_11], %19 {strides = array<i32>} : memref<16x32xf32, #tpu.memory_space<vmem>>, vector<16x32xf32>,
    %c0_i32_12 = arith.constant 0 : i32
    %21 = arith.cmpi eq, %arg1, %c0_i32_12 : i32
    %22 = arith.extui %21 : i1 to i32
    %c0_i32_13 = arith.constant 0 : i32
    %23 = arith.cmpi ne, %22, %c0_i32_13 : i32
    scf.if %23 {
      %c0_14 = arith.constant 0 : index
      %c0_15 = arith.constant 0 : index
      %24 = vector.load %arg9[%c0_14, %c0_15] : memref<16x32xf32, #tpu.memory_space<vmem>>, vector<16x32xf32>
      %c0_16 = arith.constant 0 : index
      %c0_17 = arith.constant 0 : index
      %25 = vector.load %arg11[%c0_16, %c0_17] : memref<16x32xf32, #tpu.memory_space<vmem>>, vector<16x32xf32>
      %26 = arith.addf %24, %25 : vector<16x32xf32>
      %c0_18 = arith.constant 0 : index
      %c0_19 = arith.constant 0 : index
      %27 = vector.load %arg8[%c0_18, %c0_19] : memref<16x32xf32, #tpu.memory_space<vmem>>, vector<16x32xf32>
      tpu.vector_store %arg8[%c0_18, %c0_19], %26 {strides = array<i32>} : memref<16x32xf32, #tpu.memory_space<vmem>>, vector<16x32xf32>,
    } else {
    }
    return
  }
  func.func @transform_0(%arg0: i32, %arg1: i32) -> (i32, i32) {
    %c0_i32 = arith.constant 0 : i32
    %c0_i32_0 = arith.constant 0 : i32
    return %arg0, %c0_i32 : i32, i32
  }
  func.func @transform_1(%arg0: i32, %arg1: i32) -> (i32, i32) {
    %c0_i32 = arith.constant 0 : i32
    %c0_i32_0 = arith.constant 0 : i32
    return %arg0, %c0_i32 : i32, i32
  }
  func.func @transform_2(%arg0: i32, %arg1: i32) -> (i32, i32) {
    %c0_i32 = arith.constant 0 : i32
    %c0_i32_0 = arith.constant 0 : i32
    %c0_i32_1 = arith.constant 0 : i32
    return %c0_i32, %c0_i32_0 : i32, i32
  }
  func.func @transform_3(%arg0: i32, %arg1: i32) -> (i32, i32) {
    %c0_i32 = arith.constant 0 : i32
    %c0_i32_0 = arith.constant 0 : i32
    %c0_i32_1 = arith.constant 0 : i32
    return %c0_i32, %c0_i32_0 : i32, i32
  }
  func.func @transform_4(%arg0: i32, %arg1: i32) -> (i32, i32) {
    %c0_i32 = arith.constant 0 : i32
    %c0_i32_0 = arith.constant 0 : i32
    return %c0_i32, %arg1 : i32, i32
  }
  func.func @transform_5(%arg0: i32, %arg1: i32) -> (i32, i32) {
    %c0_i32 = arith.constant 0 : i32
    %c0_i32_0 = arith.constant 0 : i32
    return %arg1, %c0_i32 : i32, i32
  }
  func.func @transform_6(%arg0: i32, %arg1: i32) -> (i32, i32) {
    %c0_i32 = arith.constant 0 : i32
    %c0_i32_0 = arith.constant 0 : i32
    return %arg0, %c0_i32 : i32, i32
  }
}

</mosaic_0001>

<bundles_post_ra>
// kernel: tpu_custom_call.1
= control target key start
LH: loop header
LB: loop body
LE: loop exit
PB: predicated region body
PF: predicated region fallthrough
CT: control target
= control target key end

     0   :  { %11 = vsyncpa [#allocation6], 0  ;;  %s599_s0 = inlined_call_operand.vmem [shape: f32[16,32], index: 0, kind: input, shape index: {}]   ;;  %s600_s1 = inlined_call_operand.vmem [shape: f32[16,32], index: 1, kind: input, shape index: {}]   ;;  %s601_s2 = inlined_call_operand.vmem [shape: bf16[32,32], index: 2, kind: input, shape index: {}]   ;;  %s602_s3 = inlined_call_operand.vmem [shape: f32[1,32], index: 3, kind: input, shape index: {}]   ;;  %s603_s4 = inlined_call_operand.hbm [shape: bf16[32,128], index: 4, kind: input, shape index: {}]   ;;  %s604_s5 = inlined_call_operand.vmem [shape: bf16[64,32], index: 5, kind: input, shape index: {}]   ;;  %s605_s6 = inlined_call_operand.hbm [shape: f32[16,32], index: 6, kind: output, shape index: {}]  }
   0x1   :  { %12 = vsyncpa [#allocation7], 0  ;;  %s485_s21 = smov [#allocation5]  }
   0x2   :  { %s26_s22 = sshll.u32 %s485_s21, 4  ;;  %s27_s22 = int_to_ptr.vmem [resolvable:$true] %s26_s22 }
   0x3   :  { %s449_s23 = scalar_lea.vmem %s27_s22, 256  ;;  %p454_p1 = scmp.lt.s32.totalorder %s27_s22, %s27_s22 }
   0x4   :  { %p450_p0 = scmp.ne.s32.totalorder %s27_s22, %s449_s23  ;;  %p455_p2 = scmp.lt.s32.totalorder %s449_s23, %s449_s23 }
   0x6   :  { %p456_p3 = por %p455_p2, %p454_p1 }
   0x8   :  { %p457_p4 = pnand %p456_p3, %p450_p0 }
   0xa   :  { %460 = shalt.err (!%p457_p4)
}
   0xb   :  { %s486_s24 = smov 64   ;;  %s487_s25 = smov 4  }
   0xc   :  { %32 = dma.hbm_to_vmem [thread:$0]  %s603_s4, 256, %s27_s22, [#allocation6], %s486_s24, %s486_s24, %s487_s25  }
   0xd   :  { %481 = dma.done.wait [#allocation6], 256  }
   0xe   :  { %482 = vsyncadd [#allocation6], 4294967040  ;;  %vm64_vm0 = vcmask 261120   ;;  %v488_v0 = vmov 0.0   ;;  %vm489_vm1 = vmmov 0   ;;  %v420_v1 = vld [vmem:[%s601_s2 + $0x8] sm:$0xff]  }
   0xf   :  { %384 = vmatprep.subr.bf16.mxu1 %v488_v0  ;;  %388 = vmatprep.mubr.msk.bf16.mxu1 %vm489_vm1, %v488_v0  ;;  %148 = vst.msk [vmem:[#allocation4] sm:$0xff] %vm64_vm0, %v488_v0  ;;  %149 = vst.msk [vmem:[#allocation4 + $0x8] sm:$0xff] %vm64_vm0, %v488_v0  ;;  %v421_v2 = vld [vmem:[%s601_s2] sm:$0xff]   ;;  %v44_v4 = vld [vmem:[%s599_s0 + $0x8] sm:$0xff]  ;;  %vm145_vm2 = vcmask 257024   ;;  %vm277_vm3 = vcmask 523264  }
  0x10   :  { %400 = vmatprep.subr.bf16.mxu0 %v488_v0  ;;  %408 = vmatprep.mubr.msk.bf16.mxu0 %vm489_vm1, %v488_v0  ;;  %v43_v3 = vld [vmem:[%s599_s0] sm:$0xff]  ;;  %v51_v10 = vld [vmem:[%s600_s1 + $0x8] sm:$0xff]  ;;  %v422_v18 = vld [vmem:[#allocation5 + $0x8] sm:$0xff]  }
  0x11   :  { %385 = vmatpush3.bf16.msra.mxu1 %v420_v1  ;;  %v45_v5 = vpack.c.bf16 %v44_v4, %v43_v3  ;;  %v50_v6 = vld [vmem:[%s600_s1] sm:$0xff]  ;;  %v423_v19 = vld [vmem:[#allocation5] sm:$0xff]   ;;  %v425_v36 = vld [vmem:[%s604_s5 + $0x18] sm:$0xff]  }
  0x12   :  { %386 = vmatprep.subr.bf16.mxu1 %v488_v0  ;;  %v357_v27 = vld [vmem:[%s602_s3] ss:$0 sm:$0xff]  ;;  %401 = vmatpush3.bf16.msra.mxu0 %v425_v36  ;;  %v426_v37 = vld [vmem:[%s604_s5 + $0x10] sm:$0xff]   ;;  %v427_v48 = vld [vmem:[%s604_s5 + $0x8] sm:$0xff]  }
  0x13   :  { %402 = vmatprep.subr.bf16.mxu0 %v488_v0  ;;  %v428_v49 = vld [vmem:[%s604_s5] sm:$0xff]   ;;  %s490_s5 = smov [#allocation8]  }
  0x14   :  { %s342_s21 = sshll.u32 %s490_s5, 4  ;;  %s343_s21 = int_to_ptr.vmem [resolvable:$true] %s342_s21 }
  0x15   :  { %387 = vmatpush3.bf16.msra.mxu1 %v421_v2  ;;  %s461_s22 = scalar_lea.vmem %s343_s21, 256  ;;  %p466_p6 = scmp.lt.s32.totalorder %s343_s21, %s343_s21 }
  0x16   :  { %392 = vmatprep.subr.bf16.mxu1 %v488_v0  ;;  %403 = vmatpush3.bf16.msra.mxu0 %v426_v37  ;;  %v242_v59 = vld [vmem:[#allocation4] sm:$0xff]  ;;  %v243_v63 = vld [vmem:[#allocation4 + $0x8] sm:$0xff]  ;;  %p462_p5 = scmp.ne.s32.totalorder %s343_s21, %s461_s22  ;;  %p467_p7 = scmp.lt.s32.totalorder %s461_s22, %s461_s22 }
  0x17   :  { %404 = vmatprep.subr.bf16.mxu0 %v488_v0 }
  0x18   :  { %389 = vmatmul.mubr.msk.bf16.vlgmr.msra.gmra.mxu1 %vm64_vm0, %v45_v5  ;;  %p468_p8 = por %p467_p7, %p466_p6 }
  0x19   :  { %396 = vmatprep.mubr.msk.bf16.mxu1 %vm489_vm1, %v488_v0  ;;  %393 = vmatpush3.bf16.msra.mxu1 %v422_v18 }
  0x1a   :  { %394 = vmatprep.subr.bf16.mxu1 %v488_v0  ;;  %405 = vmatpush3.bf16.msra.mxu0 %v427_v48  ;;  %p469_p9 = pnand %p468_p8, %p462_p5 }
  0x1b   :  { %406 = vmatprep.subr.bf16.mxu0 %v488_v0 }
  0x1d   :  { %395 = vmatpush3.bf16.msra.mxu1 %v423_v19 }
  0x1e   :  { %407 = vmatpush3.bf16.msra.mxu0 %v428_v49 }
  0xd8   :  { %v102_v7 = vpop.f32.mrf.mxu1 }
  0xd9   :  { %v103_v8 = vadd.f32 %v102_v7, %v50_v6 }
  0xda   :  { %v390_v9 = vpop.f32.mrf.mxu1 }
  0xdb   :  { %109 = vst.msk [vmem:[#allocation2] sm:$0xff] %vm64_vm0, %v103_v8  ;;  %v111_v11 = vmul.f32 %v103_v8, %v103_v8 }
  0xdc   :  { %v105_v12 = vpop.f32.mrf.mxu1 }
  0xdd   :  { %v106_v13 = vadd.f32 %v105_v12, %v51_v10  ;;  %v113_v14 = vsel %vm64_vm0, %v111_v11, 0.0 }
  0xde   :  { %114 = vadd.xlane.f32.xlu0 %v113_v14  ;;  %v391_v15 = vpop.f32.mrf.mxu1 }
  0xdf   :  { %110 = vst.msk [vmem:[#allocation2 + $0x8] sm:$0xff] %vm64_vm0, %v106_v13  ;;  %v112_v16 = vmul.f32 %v106_v13, %v106_v13 }
  0xe1   :  { %v116_v17 = vsel %vm64_vm0, %v112_v16, 0.0 }
  0xe2   :  { %117 = vadd.xlane.f32.xlu0 %v116_v17  ;;  %v329_v3 = vld [vmem:[#allocation2] sm:$0xff] }
  0xe6   :  { %v330_v6 = vld [vmem:[#allocation2 + $0x8] sm:$0xff] }
 0x167   :  { %v115_v20 = vpop.xlane.xlu0 %114 }
 0x168   :  { %v120_v21 = vmul.f32 0.03125, %v115_v20 }
 0x16a   :  { %v122_v22 = vadd.f32 1e-06, %v120_v21 }
 0x16b   :  { %v118_v23 = vpop.xlane.xlu0 %117 }
 0x16c   :  { %429 = vrsqrt.f32 %v122_v22  ;;  %v121_v24 = vmul.f32 0.03125, %v118_v23 }
 0x16e   :  { %v123_v25 = vadd.f32 1e-06, %v121_v24 }
 0x170   :  { %431 = vrsqrt.f32 %v123_v25 }
 0x179   :  { %v430_v26 = vpop.eup %429 }
 0x17a   :  { %v126_v28 = vmul.f32 %v430_v26, %v103_v8 }
 0x17c   :  { %v135_v29 = vmul.f32 %v357_v27, %v126_v28 }
 0x17d   :  { %v432_v30 = vpop.eup %431 }
 0x17e   :  { %v371_v31 = vpack.c.bf16 %v135_v29, %v135_v29  ;;  %v127_v32 = vmul.f32 %v432_v30, %v106_v13 }
 0x180   :  { %146 = vst.msk [vmem:[#allocation3] sm:$0xf] %vm145_vm2, %v371_v31  ;;  %v136_v33 = vmul.f32 %v357_v27, %v127_v32 }
 0x182   :  { %v372_v34 = vpack.c.bf16 %v136_v33, %v136_v33 }
 0x184   :  { %147 = vst.msk [vmem:[#allocation3 + $0x4] sm:$0xf] %vm145_vm2, %v372_v34 }
 0x18b   :  { %v424_v35 = vld [vmem:[#allocation3] sm:$0xff]  }
 0x18c   :  { %397 = vmatmul.mubr.msk.bf16.vlgmr.msra.gmra.mxu1 %vm64_vm0, %v424_v35 }
 0x24c   :  { %v211_v38 = vpop.f32.mrf.mxu1 }
 0x24d   :  { %v364_v39 = vmul.f32 -1.442695, %v211_v38 }
 0x24e   :  { %v398_v40 = vpop.f32.mrf.mxu1 }
 0x24f   :  { %433 = vpow2.f32 %v364_v39 }
 0x250   :  { %v214_v41 = vpop.f32.mrf.mxu1 }
 0x251   :  { %v365_v42 = vmul.f32 -1.442695, %v214_v41 }
 0x252   :  { %v399_v43 = vpop.f32.mrf.mxu1 }
 0x253   :  { %435 = vpow2.f32 %v365_v42 }
 0x25c   :  { %v434_v44 = vpop.eup %433 }
 0x25d   :  { %v224_v45 = vadd.f32 1.0, %v434_v44 }
 0x25f   :  { %437 = vrcp.f32 %v224_v45 }
 0x260   :  { %v436_v46 = vpop.eup %435 }
 0x261   :  { %v225_v47 = vadd.f32 1.0, %v436_v46 }
 0x263   :  { %439 = vrcp.f32 %v225_v47 }
 0x26c   :  { %v438_v50 = vpop.eup %437 }
 0x26d   :  { %v230_v51 = vmul.f32 %v438_v50, %v211_v38 }
 0x26f   :  { %234 = vrot.lane.b32.xlu1 %v230_v51, %s486_s24 }
 0x270   :  { %v440_v52 = vpop.eup %439 }
 0x271   :  { %v231_v53 = vmul.f32 %v440_v52, %v214_v41 }
 0x273   :  { %236 = vrot.lane.b32.xlu1 %v231_v53, %s486_s24 }
 0x2e1   :  { %v235_v54 = vpop.permute.xlu1 %234 }
 0x2e2   :  { %v240_v56 = vmul.f32 %v235_v54, %v211_v38 }
 0x2e5   :  { %v237_v55 = vpop.permute.xlu1 %236 }
 0x2e6   :  { %v241_v57 = vmul.f32 %v237_v55, %v214_v41 }
 0x2e8   :  { %v244_v58 = vpack.c.bf16 %v241_v57, %v240_v56 }
 0x2ea   :  { %409 = vmatmul.mubr.msk.bf16.vlgmr.msra.gmra.mxu0 %vm277_vm3, %v244_v58 }
 0x3aa   :  { %v315_v60 = vpop.f32.mrf.mxu0 }
 0x3ab   :  { %v322_v61 = vadd.f32 %v315_v60, %v242_v59 }
 0x3ac   :  { %v410_v62 = vpop.f32.mrf.mxu0 }
 0x3ad   :  { %324 = vst.msk [vmem:[#allocation4] sm:$0xff] %vm64_vm0, %v322_v61 }
 0x3ae   :  { %v318_v0 = vpop.f32.mrf.mxu0 }
 0x3af   :  { %v323_v1 = vadd.f32 %v318_v0, %v243_v63 }
 0x3b0   :  { %v411_v2 = vpop.f32.mrf.mxu0 }
 0x3b1   :  { %325 = vst.msk [vmem:[#allocation4 + $0x8] sm:$0xff] %vm64_vm0, %v323_v1 }
 0x3b4   :  { %v331_v4 = vld [vmem:[#allocation4] sm:$0xff] }
 0x3b5   :  { %v333_v5 = vadd.f32 %v331_v4, %v329_v3 }
 0x3b7   :  { %335 = vst.msk [vmem:[#allocation8] sm:$0xff] %vm64_vm0, %v333_v5 }
 0x3b8   :  { %v332_v7 = vld [vmem:[#allocation4 + $0x8] sm:$0xff] }
 0x3b9   :  { %v334_v8 = vadd.f32 %v332_v7, %v330_v6 }
 0x3bb   :  { %336 = vst.msk [vmem:[#allocation8 + $0x8] sm:$0xff] %vm64_vm0, %v334_v8 }
 0x3bc   :  { %472 = shalt.err (!%p469_p9)
}
 0x3bd   :  { %s491_s23 = smov 128   ;;  %s492_s24 = smov 8  }
 0x3be   :  { %348 = dma.vmem_to_hbm [thread:$0]  %s343_s21, 256, %s605_s6, [#allocation7], %s491_s23, %s491_s23, %s492_s24  }
 0x3bf   :  { %483 = dma.done.wait [#allocation7], 256  }
 0x3c0   :  { %484 = vsyncadd [#allocation7], 4294967040 }
 0x3c1   :  { %352 = vsyncpa [#allocation6], 1 }
 0x3c2   :  { %353 = vsyncpa [#allocation7], 1 }

</bundles_post_ra>
